<compile_context>
chip_gen: v6e
topology: v6e:2x2x1
jax: 0.10.0
libtpu: 0.0.40
codegen_flags: <defaults>
</compile_context>

<pallas_src>
import functools

import jax
import jax.numpy as jnp
from jax.experimental import pallas as pl
from jax.experimental.pallas import tpu as pltpu


def _round_up(x, m):
    return (x + m - 1) // m * m


def _sublane(dtype):
    # sublane packing: f32 -> 8, bf16/f16 -> 16, int8/fp8 -> 32
    return {4: 8, 2: 16, 1: 32}.get(jnp.dtype(dtype).itemsize, 8)


def _vmem_bytes(rows, cols, dtype):
    """VMEM footprint of a (rows, cols) tile, padded to the (sublane, 128) tiling."""
    it = jnp.dtype(dtype).itemsize
    return _round_up(max(rows, 1), _sublane(dtype)) * _round_up(max(cols, 1), 128) * it


def _ae_kernel(x_ref, w1_ref, w2_ref, o_ref, *, discrete: bool):
    """One batch-tile of the autoencoder forward.

    x_ref:  [TB, D]  (VMEM)  input rows (native dtype straight to the MXU)
    w1_ref: [D, E]   (VMEM)  W1^T  (pre-transposed once in the wrapper)
    w2_ref: [E, D]   (VMEM)  W2^T  (pre-transposed once in the wrapper)
    o_ref:  [TB, D]  (VMEM)
    """
    # emb = tanh(x @ W1^T); MXU in native dtype, f32 accumulate, tanh on the EUP.
    emb = jnp.tanh(jnp.dot(x_ref[...], w1_ref[...],
                           preferred_element_type=jnp.float32))
    # y = emb @ W2^T; feed the MXU the weight's native dtype, accumulate in f32.
    y = jnp.dot(emb.astype(w2_ref.dtype), w2_ref[...],
                preferred_element_type=jnp.float32)

    if discrete:
        # Numerically stable log-softmax over the (unpadded) last dim.
        m = jnp.max(y, axis=-1, keepdims=True)
        s = y - m
        lse = jnp.log(jnp.sum(jnp.exp(s), axis=-1, keepdims=True))
        y = s - lse

    o_ref[...] = y.astype(o_ref.dtype)


def action_autoencoder_forward(act_x, w1, w2, action_space_type="discrete",
                               *, batch_tile=None):
    """act_x: [..., act_dim]; w1: [emb_dim, act_dim]; w2: [act_dim, emb_dim]
    (PyTorch nn.Linear weight layout: [out_features, in_features])."""
    orig_shape = act_x.shape
    act_dim = orig_shape[-1]
    emb_dim = w1.shape[0]
    assert w1.shape == (emb_dim, act_dim), w1.shape
    assert w2.shape == (act_dim, emb_dim), w2.shape

    discrete = action_space_type in ("discrete", "discreteNN")
    x_dtype = act_x.dtype
    w_dtype = w1.dtype

    x2 = act_x.reshape(-1, act_dim)
    B = x2.shape[0]

    # One-time weight transposes (tiny, outside the kernel) so both in-kernel
    # matmuls contract (lhs last dim) x (rhs first dim): no per-step XLU work.
    w1t = jnp.transpose(w1)   # [act_dim, emb_dim]
    w2t = jnp.transpose(w2)   # [emb_dim, act_dim]

    # ---------------- generation-aware VMEM budget -------------------------
    try:
        vmem_cap = int(pltpu.get_tpu_info().vmem_capacity_bytes)
    except Exception:  # not queryable -> assume the smallest (v7x: 64 MiB/TC)
        vmem_cap = 64 * 1024 * 1024
    # 60% of physical, capped at 96 MiB: ~76 MiB on v5e/v6e, ~38 MiB on v7x.
    budget = min(int(vmem_cap * 0.6), 96 * 1024 * 1024)

    # Pallas double-buffers every input, including the grid-invariant weights.
    weight_vmem = 2 * (_vmem_bytes(act_dim, emb_dim, w_dtype) +
                       _vmem_bytes(emb_dim, act_dim, w_dtype))
    # Per-row VMEM: double-buffered x + out tiles plus the f32 intermediates
    # (emb, y / softmax temps) the kernel body materializes.  Lane dims round
    # up to 128 inside VMEM even though HBM traffic stays unpadded.
    d_lanes = _round_up(act_dim, 128)
    e_lanes = _round_up(emb_dim, 128)
    x_it = jnp.dtype(x_dtype).itemsize
    per_row = (2 * d_lanes * x_it          # x tile, double-buffered
               + 2 * d_lanes * x_it        # out tile, double-buffered
               + 4 * (e_lanes + 3 * d_lanes))  # f32 intermediates
    slack = 2 * 1024 * 1024                # compiler-internal scratch headroom

    row_align = _sublane(x_dtype)
    max_rows = (budget - weight_vmem - slack) // per_row
    max_rows = (max_rows // row_align) * row_align
    if max_rows < row_align:
        # TODO(synk): add a weight-tiled (emb_dim/act_dim reduction) grid path
        # for layers whose double-buffered weights alone exceed the VMEM budget.
        raise ValueError(
            f"double-buffered weights ({weight_vmem} B) leave no room for a "
            f"{row_align}-row batch tile under the {budget} B VMEM budget")

    if batch_tile is None:
        batch_tile = 8192                  # step-overhead amortization target
    batch_tile = min(batch_tile, _round_up(B, row_align), max_rows)
    # Guarantee >=2 grid steps when the batch permits so the "parallel" batch
    # axis can be split across both TensorCores on v7x.
    if B >= 2 * row_align:
        batch_tile = min(batch_tile, _round_up(pl.cdiv(B, 2), row_align))
    batch_tile = max(row_align, _round_up(batch_tile, row_align))

    B_pad = _round_up(B, batch_tile)
    grid = (B_pad // batch_tile,)
    if B_pad != B:
        x2 = jnp.pad(x2, ((0, B_pad - B), (0, 0)))

    kernel = functools.partial(_ae_kernel, discrete=discrete)

    w_it = jnp.dtype(w_dtype).itemsize
    flops = 2 * 2 * B_pad * act_dim * emb_dim
    transcendentals = B_pad * emb_dim + (B_pad * act_dim if discrete else 0)
    bytes_accessed = 2 * B_pad * act_dim * x_it + 2 * act_dim * emb_dim * w_it

    out = pl.pallas_call(
        kernel,
        out_shape=jax.ShapeDtypeStruct((B_pad, act_dim), x_dtype),
        grid_spec=pl.GridSpec(
            grid=grid,
            in_specs=[
                pl.BlockSpec((batch_tile, act_dim), lambda i: (i, 0)),
                pl.BlockSpec((act_dim, emb_dim), lambda i: (0, 0)),
                pl.BlockSpec((emb_dim, act_dim), lambda i: (0, 0)),
            ],
            out_specs=pl.BlockSpec((batch_tile, act_dim), lambda i: (i, 0)),
        ),
        compiler_params=pltpu.CompilerParams(
            dimension_semantics=("parallel",),
            vmem_limit_bytes=int(budget)),
        cost_estimate=pl.CostEstimate(
            flops=int(flops),
            transcendentals=int(transcendentals),
            bytes_accessed=int(bytes_accessed)),
    )(x2, w1t, w2t)

    if B_pad != B:
        out = out[:B]
    return out.reshape(orig_shape)


def _reference(act_x, w1, w2, action_space_type):
    emb = jnp.tanh(act_x @ w1.T)
    y = emb @ w2.T
    if action_space_type in ("discrete", "discreteNN"):
        y = jax.nn.log_softmax(y, axis=-1)
    return y


if __name__ == "__main__":
    # Small, deterministic example consistent with the module's forward.
    B = 8            # batch
    act_dim = 16     # action dimension
    emb_dim = 32     # a_embed_dim

    key = jax.random.PRNGKey(0)
    kx, k1, k2 = jax.random.split(key, 3)
    act_x = jax.random.normal(kx, (B, act_dim), dtype=jnp.float32)
    # nn.Linear weight layout: [out_features, in_features]
    w1 = jax.random.normal(k1, (emb_dim, act_dim), dtype=jnp.float32) * 0.1
    w2 = jax.random.normal(k2, (act_dim, emb_dim), dtype=jnp.float32) * 0.1

    # Exercise both the log-softmax ('discrete') and Identity paths.
    for space in ("discrete", "continuous"):
        out = jax.block_until_ready(
            action_autoencoder_forward(act_x, w1, w2, space))
        ref = _reference(act_x, w1, w2, space)
        assert out.shape == (B, act_dim)
        assert jnp.allclose(out, ref, atol=1e-5, rtol=1e-5), f"mismatch ({space})"

    # Batched [T, B, act_dim] input: exercises leading-dim flattening, a
    # multi-step grid (>=2 tiles for megacore), and batch-dim padding.
    act_x3 = jax.random.normal(kx, (5, 8, act_dim), dtype=jnp.float32)
    out3 = jax.block_until_ready(
        action_autoencoder_forward(act_x3, w1, w2, "discrete"))
    ref3 = _reference(act_x3, w1, w2, "discrete")
    assert out3.shape == (5, 8, act_dim)
    assert jnp.allclose(out3, ref3, atol=1e-5, rtol=1e-5), "mismatch (3d discrete)"

    print("KERNEL_OK")
</pallas_src>

<mosaic_0001>
module attributes {stable_mosaic.version = 11 : i64} {
  func.func @_ae_kernel(%arg0: i32, %arg1: memref<8x16xf32, #tpu.memory_space<vmem>>, %arg2: memref<16x32xf32, #tpu.memory_space<vmem>>, %arg3: memref<32x16xf32, #tpu.memory_space<vmem>>, %arg4: memref<8x16xf32, #tpu.memory_space<vmem>>) attributes {dimension_semantics = [#tpu.dimension_semantics<parallel>], iteration_bounds = array<i64: 1>, scalar_prefetch = 0 : i64, scratch_operands = 0 : i64, tpu.core_type = #tpu.core_type<tc>, window_params = [{transform_indices = @transform_0, window_bounds = array<i64: 8, 16>}, {pipeline_mode = #tpu.pipeline_mode<synchronous>, transform_indices = @transform_1, window_bounds = array<i64: 16, 32>}, {pipeline_mode = #tpu.pipeline_mode<synchronous>, transform_indices = @transform_2, window_bounds = array<i64: 32, 16>}, {transform_indices = @transform_3, window_bounds = array<i64: 8, 16>}]} {
    %c0 = arith.constant 0 : index
    %c0_0 = arith.constant 0 : index
    %0 = vector.load %arg1[%c0, %c0_0] : memref<8x16xf32, #tpu.memory_space<vmem>>, vector<8x16xf32>
    %c0_1 = arith.constant 0 : index
    %c0_2 = arith.constant 0 : index
    %1 = vector.load %arg2[%c0_1, %c0_2] : memref<16x32xf32, #tpu.memory_space<vmem>>, vector<16x32xf32>
    %cst = arith.constant dense<0.000000e+00> : vector<8x32xf32>
    %2 = tpu.matmul %0, %1, %cst {dimension_numbers = #tpu.dot_dimension_numbers<[1], [0], [0], [1], [0, 0, 1, 1], [], []>} : vector<8x16xf32>, vector<16x32xf32>, vector<8x32xf32> -> vector<8x32xf32>
    %3 = math.tanh %2 : vector<8x32xf32>
    %c0_3 = arith.constant 0 : index
    %c0_4 = arith.constant 0 : index
    %4 = vector.load %arg3[%c0_3, %c0_4] : memref<32x16xf32, #tpu.memory_space<vmem>>, vector<32x16xf32>
    %cst_5 = arith.constant dense<0.000000e+00> : vector<8x16xf32>
    %5 = tpu.matmul %3, %4, %cst_5 {dimension_numbers = #tpu.dot_dimension_numbers<[1], [0], [0], [1], [0, 0, 1, 1], [], []>} : vector<8x32xf32>, vector<32x16xf32>, vector<8x16xf32> -> vector<8x16xf32>
    %cst_6 = arith.constant dense<0xFF800000> : vector<8xf32>
    %6 = vector.multi_reduction <maximumf>, %5, %cst_6 [1] : vector<8x16xf32> to vector<8xf32>
    %7 = vector.shape_cast %6 : vector<8xf32> to vector<8x1xf32>
    %8 = vector.broadcast %7 : vector<8x1xf32> to vector<8x16xf32>
    %9 = arith.subf %5, %8 : vector<8x16xf32>
    %10 = math.exp %9 : vector<8x16xf32>
    %cst_7 = arith.constant dense<0.000000e+00> : vector<8xf32>
    %11 = vector.multi_reduction <add>, %10, %cst_7 [1] : vector<8x16xf32> to vector<8xf32>
    %12 = vector.shape_cast %11 : vector<8xf32> to vector<8x1xf32>
    %13 = math.log %12 : vector<8x1xf32>
    %14 = vector.broadcast %13 : vector<8x1xf32> to vector<8x16xf32>
    %15 = arith.subf %9, %14 : vector<8x16xf32>
    %c0_8 = arith.constant 0 : index
    %c0_9 = arith.constant 0 : index
    %16 = vector.load %arg4[%c0_8, %c0_9] : memref<8x16xf32, #tpu.memory_space<vmem>>, vector<8x16xf32>
    tpu.vector_store %arg4[%c0_8, %c0_9], %15 {strides = array<i32>} : memref<8x16xf32, #tpu.memory_space<vmem>>, vector<8x16xf32>,
    return
  }
  func.func @transform_0(%arg0: i32) -> (i32, i32) {
    %c0_i32 = arith.constant 0 : i32
    %c0_i32_0 = arith.constant 0 : i32
    return %arg0, %c0_i32 : i32, i32
  }
  func.func @transform_1(%arg0: i32) -> (i32, i32) {
    %c0_i32 = arith.constant 0 : i32
    %c0_i32_0 = arith.constant 0 : i32
    %c0_i32_1 = arith.constant 0 : i32
    return %c0_i32, %c0_i32_0 : i32, i32
  }
  func.func @transform_2(%arg0: i32) -> (i32, i32) {
    %c0_i32 = arith.constant 0 : i32
    %c0_i32_0 = arith.constant 0 : i32
    %c0_i32_1 = arith.constant 0 : i32
    return %c0_i32, %c0_i32_0 : i32, i32
  }
  func.func @transform_3(%arg0: i32) -> (i32, i32) {
    %c0_i32 = arith.constant 0 : i32
    %c0_i32_0 = arith.constant 0 : i32
    return %arg0, %c0_i32 : i32, i32
  }
}

</mosaic_0001>

<bundles_post_ra>
// kernel: tpu_custom_call.1
= control target key start
LH: loop header
LB: loop body
LE: loop exit
PB: predicated region body
PF: predicated region fallthrough
CT: control target
= control target key end

     0   :  { %v257_v1 = vmov 0.0   ;;  %vm258_vm0 = vmmov 0   ;;  %s308_s0 = inlined_call_operand.vmem [shape: f32[8,16], index: 0, kind: input, shape index: {}]   ;;  %s309_s1 = inlined_call_operand.vmem [shape: f32[16,32], index: 1, kind: input, shape index: {}]   ;;  %s310_s2 = inlined_call_operand.vmem [shape: f32[32,16], index: 2, kind: input, shape index: {}]   ;;  %s311_s3 = inlined_call_operand.hbm [shape: f32[8,16], index: 3, kind: output, shape index: {}]  }
   0x1   :  { %v17_v0 = vld [vmem:[%s309_s1 + $0x8] sm:$0xff]  ;;  %208 = vmatprep.subr.mxu0 %v257_v1  ;;  %v16_v2 = vld [vmem:[%s309_s1] sm:$0xff]  ;;  %212 = vmatprep.mubr.msk.f32.mxu0 %vm258_vm0, %v257_v1 }
   0x2   :  { %8 = vsyncpa [#allocation3], 0  ;;  %209 = vmatpush3.msra.mxu0 %v17_v0  ;;  %v15_v3 = vld [vmem:[%s308_s0] sm:$0xff]  ;;  %vm18_vm1 = vcmask 130048   ;;  %215 = vmatprep.subr.mxu1 %v257_v1  ;;  %v96_v4 = vld [vmem:[%s310_s2 + $0x18] sm:$0xff]  ;;  %vm97_vm2 = vcmask 261120  }
   0x3   :  { %210 = vmatprep.subr.mxu0 %v257_v1  ;;  %223 = vmatprep.mubr.msk.f32.mxu1 %vm258_vm0, %v257_v1  ;;  %v95_v5 = vld [vmem:[%s310_s2 + $0x10] sm:$0xff]  ;;  %v94_v6 = vld [vmem:[%s310_s2 + $0x8] sm:$0xff]  ;;  %v93_v7 = vld [vmem:[%s310_s2] sm:$0xff]  ;;  %s259_s2 = smov [#allocation2]  }
   0x4   :  { %211 = vmatpush3.msra.mxu0 %v16_v2  ;;  %216 = vmatpush3.msra.mxu1 %v96_v4  ;;  %s190_s24 = sshll.u32 %s259_s2, 4  ;;  %s191_s24 = int_to_ptr.vmem [resolvable:$true] %s190_s24 }
   0x5   :  { %213 = vmatmul.mubr.msk.f32.vlgmr.msra.gmra.mxu0 %vm18_vm1, %v15_v3  ;;  %217 = vmatprep.subr.mxu1 %v257_v1  ;;  %s235_s25 = scalar_lea.vmem %s191_s24, 128  ;;  %p240_p1 = scmp.lt.s32.totalorder %s191_s24, %s191_s24 }
   0x6   :  { %218 = vmatpush3.msra.mxu1 %v95_v5  ;;  %p236_p0 = scmp.ne.s32.totalorder %s191_s24, %s235_s25  ;;  %p241_p2 = scmp.lt.s32.totalorder %s235_s25, %s235_s25 }
   0x7   :  { %219 = vmatprep.subr.mxu1 %v257_v1 }
   0x8   :  { %220 = vmatpush3.msra.mxu1 %v94_v6  ;;  %p242_p3 = por %p241_p2, %p240_p1 }
   0x9   :  { %221 = vmatprep.subr.mxu1 %v257_v1 }
   0xa   :  { %222 = vmatpush3.msra.mxu1 %v93_v7  ;;  %p243_p4 = pnand %p242_p3, %p236_p0 }
  0xc5   :  { %v88_v8 = vpop.f32.mrf.mxu0 }
  0xc6   :  { %229 = vtanh.f32 %v88_v8 }
  0xc7   :  { %v214_v9 = vpop.f32.mrf.mxu0 }
  0xd3   :  { %v230_v10 = vpop.eup %229 }
  0xd4   :  { %224 = vmatmul.mubr.msk.f32.vlgmr.msra.gmra.mxu1 %vm97_vm2, %v230_v10 }
 0x194   :  { %v167_v11 = vpop.f32.mrf.mxu1 }
 0x195   :  { %v171_v12 = vsel %vm18_vm1, %v167_v11, -inf }
 0x196   :  { %172 = vmax.xlane.f32.xlu0 %v171_v12  ;;  %v225_v13 = vpop.f32.mrf.mxu1 }
 0x21f   :  { %v173_v14 = vpop.xlane.xlu0 %172 }
 0x220   :  { %v174_v15 = vsub.f32 %v167_v11, %v173_v14 }
 0x222   :  { %v175_v16 = vmul.f32 1.442695, %v174_v15 }
 0x224   :  { %231 = vpow2.f32 %v175_v16 }
 0x231   :  { %v232_v17 = vpop.eup %231 }
 0x232   :  { %v177_v18 = vsel %vm18_vm1, %v232_v17, 0.0 }
 0x233   :  { %178 = vadd.xlane.f32.xlu0 %v177_v18 }
 0x2bc   :  { %v179_v19 = vpop.xlane.xlu0 %178 }
 0x2bd   :  { %233 = vlog2.f32 %v179_v19 }
 0x2ca   :  { %v234_v20 = vpop.eup %233 }
 0x2cb   :  { %v181_v21 = vmul.f32 0.6931472, %v234_v20 }
 0x2cd   :  { %v182_v22 = vsub.f32 %v174_v15, %v181_v21 }
 0x2cf   :  { %183 = vst.msk [vmem:[#allocation2] sm:$0xff] %vm18_vm1, %v182_v22 }
 0x2d0   :  { %246 = shalt.err (!%p243_p4)
}
 0x2d1   :  { %193 = dma.vmem_to_hbm [thread:$0]  %s191_s24, 128, %s311_s3, [#allocation3]  }
 0x2d2   :  { %255 = dma.done.wait [#allocation3], 128  }
 0x2d3   :  { %256 = vsyncadd [#allocation3], 4294967168 }
 0x2d4   :  { %197 = vsyncpa [#allocation3], 1 }

</bundles_post_ra>
